<compile_context>
chip_gen: v7x
topology: tpu7x:2x2x1
jax: 0.10.0
libtpu: 0.0.40
codegen_flags: <defaults>
</compile_context>

<pallas_src>
import functools

import jax
import jax.numpy as jnp
from jax.experimental import pallas as pl
from jax.experimental.pallas import tpu as pltpu


def mlp_kernel(xT_ref, w1t_ref, b1_ref, w2t_ref, b2_ref, oT_ref):
    # Feature-major: batch on lanes, features on sublanes.
    xT = xT_ref[...]                                               # (D_in, TB), compute dtype
    # Layer 1 on the MXU: (H, D_in) @ (D_in, TB) -> (H, TB), f32 accumulation.
    h = jnp.dot(w1t_ref[...], xT, preferred_element_type=jnp.float32)
    # Bias-add (VPU) + tanh (EUP) in the activation dtype (bf16 on v6e/v7x, f32 on v5e).
    h = jnp.tanh(h.astype(b1_ref.dtype) + b1_ref[...])
    # Layer 2 on the MXU: (D_out, H) @ (H, TB) -> (D_out, TB); lane-dense output store.
    y = jnp.dot(w2t_ref[...], h.astype(w2t_ref.dtype), preferred_element_type=jnp.float32)
    oT_ref[...] = (y + b2_ref[...]).astype(oT_ref.dtype)


def _round_up(n, m):
    return ((n + m - 1) // m) * m


def _tile_batch(batch, block_batch):
    """Pick a lane-aligned batch tile: big enough to amortize per-step overhead,
    >= 4 blocks when the batch allows it (v7x megacore), padding waste < one tile."""
    b_lane = _round_up(batch, 128)
    n_tiles = b_lane // 128
    max_tiles_per_block = max(1, block_batch // 128)
    min_blocks = min(4, n_tiles)
    num_blocks = max(min_blocks, pl.cdiv(n_tiles, max_tiles_per_block))
    tiles_per_block = pl.cdiv(n_tiles, num_blocks)
    tb = tiles_per_block * 128
    num_blocks = pl.cdiv(n_tiles, tiles_per_block)
    return tb, num_blocks, num_blocks * tb


def _default_activation_dtype():
    # bf16 VPU/EUP exist on v6e / v7x; v5e (and older) would emulate or reject bf16 tanh.
    try:
        kind = jax.devices()[0].device_kind.lower()
    except Exception:
        return jnp.float32
    if "v6" in kind or "v7" in kind or "7x" in kind:
        return jnp.bfloat16
    return jnp.float32


def mlp_forward_feature_major(xT, w1t, b1, w2t, b2, *, block_batch=32768,
                              compute_dtype=jnp.bfloat16,
                              activation_dtype=jnp.float32,
                              out_dtype=jnp.float32):
    """Feature-major forward: xT is (D_in, B); returns (D_out, B). No transposes anywhere."""
    D_in, B = xT.shape
    H = w1t.shape[0]
    D_out = w2t.shape[0]
    TB, num_blocks, B_pad = _tile_batch(B, block_batch)

    # Pad only the batch (lane) axis, never the feature axis out to 128.
    xT_c = xT.astype(compute_dtype)
    if B_pad != B:
        xT_c = jnp.pad(xT_c, ((0, 0), (0, B_pad - B)))
    w1t_c = w1t.astype(compute_dtype)
    w2t_c = w2t.astype(compute_dtype)
    b1_a = b1.reshape(H, 1).astype(activation_dtype)
    b2_f = b2.reshape(D_out, 1).astype(jnp.float32)

    cost = pl.CostEstimate(
        flops=int(2 * B_pad * (D_in * H + H * D_out)),
        transcendentals=int(B_pad * H),
        bytes_accessed=int(
            xT_c.size * xT_c.dtype.itemsize
            + B_pad * D_out * jnp.dtype(out_dtype).itemsize
            + w1t_c.size * w1t_c.dtype.itemsize
            + w2t_c.size * w2t_c.dtype.itemsize
            + b1_a.size * b1_a.dtype.itemsize
            + b2_f.size * 4
        ),
    )

    grid_spec = pltpu.PrefetchScalarGridSpec(
        num_scalar_prefetch=0,
        grid=(num_blocks,),
        in_specs=[
            pl.BlockSpec((D_in, TB), lambda i: (0, i)),    # x tile: batch on lanes
            pl.BlockSpec((H, D_in), lambda i: (0, 0)),     # w1^T: VMEM-resident
            pl.BlockSpec((H, 1), lambda i: (0, 0)),        # b1
            pl.BlockSpec((D_out, H), lambda i: (0, 0)),    # w2^T
            pl.BlockSpec((D_out, 1), lambda i: (0, 0)),    # b2
        ],
        out_specs=pl.BlockSpec((D_out, TB), lambda i: (0, i)),
    )

    yT = pl.pallas_call(
        mlp_kernel,
        out_shape=jax.ShapeDtypeStruct((D_out, B_pad), out_dtype),
        grid_spec=grid_spec,
        compiler_params=pltpu.CompilerParams(
            # Batch grid splits across v7x's 2 TensorCores; no-op on v5e/v6e.
            # TODO(synk): if a v7x profile shows one core idle, switch to pltpu.CORE_PARALLEL.
            dimension_semantics=("parallel",),
            vmem_limit_bytes=32 * 1024 * 1024,             # feature-major tiles: ~1.6 MiB at TB=32K
        ),
        cost_estimate=cost,
    )(xT_c, w1t_c, b1_a, w2t_c, b2_f)

    return yT[:, :B] if B_pad != B else yT


@functools.partial(
    jax.jit,
    static_argnames=("block_batch", "compute_dtype", "activation_dtype", "out_dtype"))
def _mlp_forward_jit(x, w1t, b1, w2t, b2, *, block_batch, compute_dtype,
                     activation_dtype, out_dtype):
    # Everything (transpose/cast/pad + kernel + transpose-back/slice) fuses under one jit,
    # so the wrapper layout plumbing does not run as separate eager HBM passes.
    yT = mlp_forward_feature_major(
        x.T, w1t, b1, w2t, b2, block_batch=block_batch, compute_dtype=compute_dtype,
        activation_dtype=activation_dtype, out_dtype=out_dtype)
    return yT.T


def mlp_forward(x, w1t, b1, w2t, b2, *, block_batch=32768, compute_dtype=jnp.bfloat16,
                activation_dtype=None, out_dtype=jnp.float32):
    """Batch-major API matching the PyTorch module: x (B, D_in) -> (B, D_out)."""
    if activation_dtype is None:
        activation_dtype = _default_activation_dtype()
    return _mlp_forward_jit(x, w1t, b1, w2t, b2, block_batch=block_batch,
                            compute_dtype=compute_dtype,
                            activation_dtype=activation_dtype, out_dtype=out_dtype)


def init_params(key, input_dim=6, hidden_dim=128, output_dim=3):
    # PyTorch nn.Linear default init: U(-1/sqrt(fan_in), 1/sqrt(fan_in)); weights kept in
    # PyTorch (out_features, in_features) layout, which is exactly what the kernel wants.
    k1, k2, k3, k4 = jax.random.split(key, 4)
    lim1 = 1.0 / float(jnp.sqrt(jnp.float32(input_dim)))
    lim2 = 1.0 / float(jnp.sqrt(jnp.float32(hidden_dim)))
    w1t = jax.random.uniform(k1, (hidden_dim, input_dim), jnp.float32, -lim1, lim1)
    b1 = jax.random.uniform(k2, (hidden_dim, 1), jnp.float32, -lim1, lim1)
    w2t = jax.random.uniform(k3, (output_dim, hidden_dim), jnp.float32, -lim2, lim2)
    b2 = jax.random.uniform(k4, (output_dim, 1), jnp.float32, -lim2, lim2)
    return w1t, b1, w2t, b2


def reference_forward(x, w1t, b1, w2t, b2):
    h = jnp.tanh(x @ w1t.T + b1.T)
    return h @ w2t.T + b2.T


if __name__ == "__main__":
    key = jax.random.PRNGKey(0)
    kx, kx2, kp = jax.random.split(key, 3)

    batch, input_dim, hidden_dim, output_dim = 8, 6, 128, 3
    x = jax.random.normal(kx, (batch, input_dim), jnp.float32)
    params = init_params(kp, input_dim, hidden_dim, output_dim)
    ref = reference_forward(x, *params)

    # Exactness check with an all-f32 path (MXU f32 emulation -> tight tolerance).
    out_f32 = mlp_forward(x, *params, compute_dtype=jnp.float32,
                          activation_dtype=jnp.float32)
    jax.block_until_ready(out_f32)
    assert out_f32.shape == (batch, output_dim)
    assert jnp.allclose(out_f32, ref, atol=1e-5, rtol=1e-5)

    # Default fast path: bf16 MXU operands, generation-gated bf16/f32 activations.
    out_fast = mlp_forward(x, *params)
    jax.block_until_ready(out_fast)
    assert out_fast.shape == (batch, output_dim)
    assert jnp.allclose(out_fast, ref, atol=5e-2, rtol=5e-2)

    # Larger, non-tile-aligned batch: exercises multi-block grid + batch padding + slice.
    big_batch = 1000
    xb = jax.random.normal(kx2, (big_batch, input_dim), jnp.float32)
    refb = reference_forward(xb, *params)
    out_big = mlp_forward(xb, *params)
    jax.block_until_ready(out_big)
    assert out_big.shape == (big_batch, output_dim)
    assert jnp.allclose(out_big, refb, atol=5e-2, rtol=5e-2)

    print("KERNEL_OK")
</pallas_src>

<mosaic_0001>
module attributes {stable_mosaic.version = 11 : i64} {
  func.func @mlp_kernel(%arg0: i32, %arg1: memref<6x128xf32, #tpu.memory_space<vmem>>, %arg2: memref<128x6xf32, #tpu.memory_space<vmem>>, %arg3: memref<128x1xf32, #tpu.memory_space<vmem>>, %arg4: memref<3x128xf32, #tpu.memory_space<vmem>>, %arg5: memref<3x1xf32, #tpu.memory_space<vmem>>, %arg6: memref<3x128xf32, #tpu.memory_space<vmem>>) attributes {dimension_semantics = [#tpu.dimension_semantics<parallel>], iteration_bounds = array<i64: 1>, scalar_prefetch = 0 : i64, scratch_operands = 0 : i64, tpu.core_type = #tpu.core_type<tc>, window_params = [{transform_indices = @transform_0, window_bounds = array<i64: 6, 128>}, {pipeline_mode = #tpu.pipeline_mode<synchronous>, transform_indices = @transform_1, window_bounds = array<i64: 128, 6>}, {pipeline_mode = #tpu.pipeline_mode<synchronous>, transform_indices = @transform_2, window_bounds = array<i64: 128, 1>}, {pipeline_mode = #tpu.pipeline_mode<synchronous>, transform_indices = @transform_3, window_bounds = array<i64: 3, 128>}, {pipeline_mode = #tpu.pipeline_mode<synchronous>, transform_indices = @transform_4, window_bounds = array<i64: 3, 1>}, {transform_indices = @transform_5, window_bounds = array<i64: 3, 128>}]} {
    %c0 = arith.constant 0 : index
    %c0_0 = arith.constant 0 : index
    %0 = vector.load %arg1[%c0, %c0_0] : memref<6x128xf32, #tpu.memory_space<vmem>>, vector<6x128xf32>
    %c0_1 = arith.constant 0 : index
    %c0_2 = arith.constant 0 : index
    %1 = vector.load %arg2[%c0_1, %c0_2] : memref<128x6xf32, #tpu.memory_space<vmem>>, vector<128x6xf32>
    %cst = arith.constant dense<0.000000e+00> : vector<128x128xf32>
    %2 = tpu.matmul %1, %0, %cst {dimension_numbers = #tpu.dot_dimension_numbers<[1], [0], [0], [1], [0, 0, 1, 1], [], []>} : vector<128x6xf32>, vector<6x128xf32>, vector<128x128xf32> -> vector<128x128xf32>
    %c0_3 = arith.constant 0 : index
    %c0_4 = arith.constant 0 : index
    %3 = vector.load %arg3[%c0_3, %c0_4] : memref<128x1xf32, #tpu.memory_space<vmem>>, vector<128x1xf32>
    %4 = vector.broadcast %3 : vector<128x1xf32> to vector<128x128xf32>
    %5 = arith.addf %2, %4 : vector<128x128xf32>
    %6 = math.tanh %5 : vector<128x128xf32>
    %c0_5 = arith.constant 0 : index
    %c0_6 = arith.constant 0 : index
    %7 = vector.load %arg4[%c0_5, %c0_6] : memref<3x128xf32, #tpu.memory_space<vmem>>, vector<3x128xf32>
    %cst_7 = arith.constant dense<0.000000e+00> : vector<3x128xf32>
    %8 = tpu.matmul %7, %6, %cst_7 {dimension_numbers = #tpu.dot_dimension_numbers<[1], [0], [0], [1], [0, 0, 1, 1], [], []>} : vector<3x128xf32>, vector<128x128xf32>, vector<3x128xf32> -> vector<3x128xf32>
    %c0_8 = arith.constant 0 : index
    %c0_9 = arith.constant 0 : index
    %9 = vector.load %arg5[%c0_8, %c0_9] : memref<3x1xf32, #tpu.memory_space<vmem>>, vector<3x1xf32>
    %10 = vector.broadcast %9 : vector<3x1xf32> to vector<3x128xf32>
    %11 = arith.addf %8, %10 : vector<3x128xf32>
    %c0_10 = arith.constant 0 : index
    %c0_11 = arith.constant 0 : index
    %12 = vector.load %arg6[%c0_10, %c0_11] : memref<3x128xf32, #tpu.memory_space<vmem>>, vector<3x128xf32>
    tpu.vector_store %arg6[%c0_10, %c0_11], %11 {strides = array<i32>} : memref<3x128xf32, #tpu.memory_space<vmem>>, vector<3x128xf32>,
    return
  }
  func.func @transform_0(%arg0: i32) -> (i32, i32) {
    %c0_i32 = arith.constant 0 : i32
    %c0_i32_0 = arith.constant 0 : i32
    return %c0_i32, %arg0 : i32, i32
  }
  func.func @transform_1(%arg0: i32) -> (i32, i32) {
    %c0_i32 = arith.constant 0 : i32
    %c0_i32_0 = arith.constant 0 : i32
    %c0_i32_1 = arith.constant 0 : i32
    return %c0_i32, %c0_i32_0 : i32, i32
  }
  func.func @transform_2(%arg0: i32) -> (i32, i32) {
    %c0_i32 = arith.constant 0 : i32
    %c0_i32_0 = arith.constant 0 : i32
    %c0_i32_1 = arith.constant 0 : i32
    return %c0_i32, %c0_i32_0 : i32, i32
  }
  func.func @transform_3(%arg0: i32) -> (i32, i32) {
    %c0_i32 = arith.constant 0 : i32
    %c0_i32_0 = arith.constant 0 : i32
    %c0_i32_1 = arith.constant 0 : i32
    return %c0_i32, %c0_i32_0 : i32, i32
  }
  func.func @transform_4(%arg0: i32) -> (i32, i32) {
    %c0_i32 = arith.constant 0 : i32
    %c0_i32_0 = arith.constant 0 : i32
    %c0_i32_1 = arith.constant 0 : i32
    return %c0_i32, %c0_i32_0 : i32, i32
  }
  func.func @transform_5(%arg0: i32) -> (i32, i32) {
    %c0_i32 = arith.constant 0 : i32
    %c0_i32_0 = arith.constant 0 : i32
    return %c0_i32, %arg0 : i32, i32
  }
}

</mosaic_0001>

<bundles_post_ra>
// kernel: _mlp_forward_jit.1
= control target key start
LH: loop header
LB: loop body
LE: loop exit
PB: predicated region body
PF: predicated region fallthrough
CT: control target
= control target key end

     0   :  { %vm182_vm0 = vcmask 1045504   ;;  %vm133_vm1 = vcmask 48128   ;;  %v603_v3 = vmov 0   ;;  %v604_v35 = vmov 0.0|0.0   ;;  %s769_s0 = inlined_call_operand.vmem [shape: f32[6,128], index: 0, kind: input, shape index: {}]   ;;  %s770_s1 = inlined_call_operand.vmem [shape: f32[128,6], index: 1, kind: input, shape index: {}]   ;;  %s771_s2 = inlined_call_operand.vmem [shape: f32[128,1], index: 2, kind: input, shape index: {}]   ;;  %s772_s4 = inlined_call_operand.vmem [shape: f32[3,1], index: 4, kind: input, shape index: {}]   ;;  %s773_s3 = inlined_call_operand.vmem [shape: f32[3,128], index: 3, kind: input, shape index: {}]   ;;  %s774_s5 = inlined_call_operand.vmem [shape: f32[3,128], index: 5, kind: output, shape index: {}]  }
   0x1   :  { %v20_v0 = vld [vmem:[%s769_s0] sm:$0x3f]  ;;  %v22_v2 = vld [vmem:[%s770_s1 + $0x8] sm:$0xff]  ;;  %569 = vset.pattern.permute.xlu0 %v603_v3  ;;  %570 = vset.pattern.permute.xlu1 %v603_v3  ;;  %v23_v4 = vld [vmem:[%s770_s1 + $0x10] sm:$0xff]  ;;  %vm605_vm2 = vmmov 0   ;;  %v606_v36 = vmov 0.0  }
   0x2   :  { %v21_v1 = vld [vmem:[%s770_s1] sm:$0xff]  ;;  %480 = vmatprep.subr.msk.mxu0 %vm182_vm0, %v20_v0  ;;  %v24_v5 = vld [vmem:[%s770_s1 + $0x18] sm:$0xff]  ;;  %v39_v8 = vld [vmem:[%s771_s2 + $0x10] sm:$0xff]  ;;  %541 = vmatprep.subr.bf16.mxu1 %v604_v35 }
   0x3   :  { %482 = vmatprep.mubr.msk.f32.mxu0 %vm133_vm1, %v21_v1  ;;  %481 = vmatpush3.msk.msra.mxu0 %vm182_vm0, %v20_v0  ;;  %v25_v6 = vld [vmem:[%s770_s1 + $0x20] sm:$0xff]  ;;  %v38_v9 = vld [vmem:[%s771_s2 + $0x8] sm:$0xff]  ;;  %v40_v11 = vld [vmem:[%s771_s2 + $0x18] sm:$0xff] }
   0x4   :  { %483 = vmatmul.mubr.msk.f32.vlgmr.msra.gmra.mrb[0].mxu0 %vm133_vm1, %v22_v2  ;;  %v37_v7 = vld [vmem:[%s771_s2] sm:$0xff]  ;;  %65 = vperm.xlu1 %570, %v39_v8   ;;  %v26_v10 = vld [vmem:[%s770_s1 + $0x28] sm:$0xff]  ;;  %v27_v12 = vld [vmem:[%s770_s1 + $0x30] sm:$0xff] }
   0x5   :  { %485 = vmatprep.mubr.msk.f32.mxu0 %vm133_vm1, %v23_v4  ;;  %55 = vperm.xlu0 %569, %v37_v7   ;;  %v41_v13 = vld [vmem:[%s771_s2 + $0x20] sm:$0xff]  ;;  %v28_v14 = vld [vmem:[%s770_s1 + $0x38] sm:$0xff]  ;;  %v42_v15 = vld [vmem:[%s771_s2 + $0x28] sm:$0xff] }
   0x6   :  { %v29_v16 = vld [vmem:[%s770_s1 + $0x40] sm:$0xff]  ;;  %v43_v17 = vld [vmem:[%s771_s2 + $0x30] sm:$0xff]  ;;  %v30_v18 = vld [vmem:[%s770_s1 + $0x48] sm:$0xff]  ;;  %538 = vmatprep.mubr.msk.f32.mxu1 %vm605_vm2, %v606_v36 }
   0x7   :  { %v44_v19 = vld [vmem:[%s771_s2 + $0x38] sm:$0xff]  ;;  %v31_v20 = vld [vmem:[%s770_s1 + $0x50] sm:$0xff]  ;;  %v45_v21 = vld [vmem:[%s771_s2 + $0x40] sm:$0xff] }
   0x8   :  { %486 = vmatmul.mubr.msk.f32.gmra.mrb[2].mxu0 %vm133_vm1, %v24_v5  ;;  %70 = vperm.xlu1 %570, %v40_v11   ;;  %v32_v22 = vld [vmem:[%s770_s1 + $0x58] sm:$0xff]  ;;  %v46_v23 = vld [vmem:[%s771_s2 + $0x48] sm:$0xff]  ;;  %v33_v24 = vld [vmem:[%s770_s1 + $0x60] sm:$0xff] }
   0x9   :  { %488 = vmatprep.mubr.msk.f32.mxu0 %vm133_vm1, %v25_v6  ;;  %60 = vperm.xlu0 %569, %v38_v9   ;;  %v47_v25 = vld [vmem:[%s771_s2 + $0x50] sm:$0xff]  ;;  %v34_v26 = vld [vmem:[%s770_s1 + $0x68] sm:$0xff]  ;;  %v48_v27 = vld [vmem:[%s771_s2 + $0x58] sm:$0xff] }
   0xa   :  { %v35_v28 = vld [vmem:[%s770_s1 + $0x70] sm:$0xff]  ;;  %v49_v29 = vld [vmem:[%s771_s2 + $0x60] sm:$0xff]  ;;  %v36_v30 = vld [vmem:[%s770_s1 + $0x78] sm:$0xff] }
   0xb   :  { %v50_v31 = vld [vmem:[%s771_s2 + $0x68] sm:$0xff]  ;;  %v51_v32 = vld [vmem:[%s771_s2 + $0x70] sm:$0xff]  ;;  %v52_v33 = vld [vmem:[%s771_s2 + $0x78] sm:$0xff] }
   0xc   :  { %489 = vmatmul.mubr.msk.f32.gmra.mrb[4].mxu0 %vm133_vm1, %v26_v10  ;;  %80 = vperm.xlu1 %570, %v42_v15   ;;  %v348_v34 = vld [vmem:[%s772_s4] sm:$0x7] }
   0xd   :  { %491 = vmatprep.mubr.msk.f32.mxu0 %vm133_vm1, %v27_v12  ;;  %75 = vperm.xlu0 %569, %v41_v13  }
  0x10   :  { %492 = vmatmul.mubr.msk.f32.gmra.mrb[6].mxu0 %vm133_vm1, %v28_v14  ;;  %90 = vperm.xlu1 %570, %v44_v19  }
  0x11   :  { %494 = vmatprep.mubr.msk.f32.mxu0 %vm133_vm1, %v29_v16  ;;  %85 = vperm.xlu0 %569, %v43_v17  }
  0x14   :  { %495 = vmatmul.mubr.msk.f32.gmra.mrb[8].mxu0 %vm133_vm1, %v30_v18  ;;  %100 = vperm.xlu1 %570, %v46_v23  }
  0x15   :  { %497 = vmatprep.mubr.msk.f32.mxu0 %vm133_vm1, %v31_v20  ;;  %95 = vperm.xlu0 %569, %v45_v21  }
  0x18   :  { %498 = vmatmul.mubr.msk.f32.gmra.mrb[10].mxu0 %vm133_vm1, %v32_v22  ;;  %110 = vperm.xlu1 %570, %v48_v27  }
  0x19   :  { %500 = vmatprep.mubr.msk.f32.mxu0 %vm133_vm1, %v33_v24  ;;  %105 = vperm.xlu0 %569, %v47_v25  }
  0x1c   :  { %501 = vmatmul.mubr.msk.f32.gmra.mrb[12].mxu0 %vm133_vm1, %v34_v26  ;;  %120 = vperm.xlu1 %570, %v50_v31  }
  0x1d   :  { %503 = vmatprep.mubr.msk.f32.mxu0 %vm133_vm1, %v35_v28  ;;  %115 = vperm.xlu0 %569, %v49_v29  }
  0x20   :  { %504 = vmatmul.mubr.msk.f32.gmra.mrb[14].mxu0 %vm133_vm1, %v36_v30  ;;  %130 = vperm.xlu1 %570, %v52_v33  }
  0x21   :  { %125 = vperm.xlu0 %569, %v51_v32  }
  0x25   :  { %351 = vperm.xlu0 %569, %v348_v34  }
  0x83   :  { %v66_v37 = vpop.permute.xlu1 %65 }
  0x84   :  { %v56_v38 = vpop.permute.xlu0 %55 }
  0x87   :  { %v71_v39 = vpop.permute.xlu1 %70 }
  0x88   :  { %v61_v40 = vpop.permute.xlu0 %60 }
  0x8b   :  { %v81_v41 = vpop.permute.xlu1 %80 }
  0x8c   :  { %v76_v42 = vpop.permute.xlu0 %75 }
  0x8f   :  { %v91_v47 = vpop.permute.xlu1 %90 }
  0x90   :  { %v86_v49 = vpop.permute.xlu0 %85 }
  0x93   :  { %v101_v56 = vpop.permute.xlu1 %100 }
  0x94   :  { %v96_v58 = vpop.permute.xlu0 %95 }
  0x97   :  { %v111_v2 = vpop.permute.xlu1 %110 }
  0x98   :  { %v106_v5 = vpop.permute.xlu0 %105 }
  0x9b   :  { %v121_v16 = vpop.permute.xlu1 %120 }
  0x9c   :  { %v116_v18 = vpop.permute.xlu0 %115 }
  0x9f   :  { %v131_v27 = vpop.permute.xlu1 %130 }
  0xa0   :  { %v126_v30 = vpop.permute.xlu0 %125 }
  0xd7   :  { %v484_v43 = vpop.f32.mrb[0].mxu0 }
  0xd8   :  { %v258_v44 = vadd.f32 %v484_v43, %v61_v40  ;;  %v252_v45 = vpop.f32.mrb[1].mxu0 }
  0xd9   :  { %v253_v46 = vadd.f32 %v252_v45, %v56_v38 }
  0xda   :  { %571 = vtanh.f32 %v258_v44 }
  0xdb   :  { %573 = vtanh.f32 %v253_v46  ;;  %v487_v48 = vpop.f32.mrb[2].mxu0  ;;  %v347_v46 = vld [vmem:[%s773_s3] sm:$0x7] }
  0xdc   :  { %v268_v50 = vadd.f32 %v487_v48, %v71_v39  ;;  %v262_v51 = vpop.f32.mrb[3].mxu0 }
  0xdd   :  { %v263_v52 = vadd.f32 %v262_v51, %v66_v37 }
  0xde   :  { %575 = vtanh.f32 %v268_v50 }
  0xdf   :  { %577 = vtanh.f32 %v263_v52  ;;  %v490_v53 = vpop.f32.mrb[4].mxu0 }
  0xe0   :  { %v278_v54 = vadd.f32 %v490_v53, %v81_v41  ;;  %v272_v55 = vpop.f32.mrb[5].mxu0 }
  0xe1   :  { %v273_v57 = vadd.f32 %v272_v55, %v76_v42 }
  0xe2   :  { %579 = vtanh.f32 %v278_v54 }
  0xe3   :  { %581 = vtanh.f32 %v273_v57  ;;  %v493_v59 = vpop.f32.mrb[6].mxu0 }
  0xe4   :  { %v572_v60 = vpop.eup %571  ;;  %v288_v61 = vadd.f32 %v493_v59, %v91_v47  ;;  %v282_v62 = vpop.f32.mrb[7].mxu0 }
  0xe5   :  { %v574_v63 = vpop.eup %573  ;;  %v283_v0 = vadd.f32 %v282_v62, %v86_v49  ;;  %v352_v47 = vpop.permute.xlu0 %351 }
  0xe6   :  { %583 = vtanh.f32 %v288_v61  ;;  %v542_v1 = vpack.c.bf16 %v572_v60, %v574_v63 }
  0xe7   :  { %585 = vtanh.f32 %v283_v0  ;;  %v496_v3 = vpop.f32.mrb[8].mxu0 }
  0xe8   :  { %v576_v4 = vpop.eup %575  ;;  %v298_v6 = vadd.f32 %v496_v3, %v101_v56  ;;  %v292_v7 = vpop.f32.mrb[9].mxu0  ;;  %543 = vmatpush3.bf16.msra.mxu1 %v542_v1 }
  0xe9   :  { %v578_v8 = vpop.eup %577  ;;  %v293_v9 = vadd.f32 %v292_v7, %v96_v58  ;;  %544 = vmatprep.subr.bf16.mxu1 %v604_v35 }
  0xea   :  { %587 = vtanh.f32 %v298_v6  ;;  %v545_v10 = vpack.c.bf16 %v576_v4, %v578_v8 }
  0xeb   :  { %589 = vtanh.f32 %v293_v9  ;;  %v499_v11 = vpop.f32.mrb[10].mxu0 }
  0xec   :  { %v580_v12 = vpop.eup %579  ;;  %v308_v13 = vadd.f32 %v499_v11, %v111_v2  ;;  %v302_v14 = vpop.f32.mrb[11].mxu0  ;;  %546 = vmatpush3.bf16.msra.mxu1 %v545_v10 }
  0xed   :  { %v582_v15 = vpop.eup %581  ;;  %v303_v17 = vadd.f32 %v302_v14, %v106_v5  ;;  %547 = vmatprep.subr.bf16.mxu1 %v604_v35 }
  0xee   :  { %591 = vtanh.f32 %v308_v13  ;;  %v548_v19 = vpack.c.bf16 %v580_v12, %v582_v15 }
  0xef   :  { %593 = vtanh.f32 %v303_v17  ;;  %v502_v20 = vpop.f32.mrb[12].mxu0 }
  0xf0   :  { %v584_v21 = vpop.eup %583  ;;  %v318_v22 = vadd.f32 %v502_v20, %v121_v16  ;;  %v312_v23 = vpop.f32.mrb[13].mxu0  ;;  %549 = vmatpush3.bf16.msra.mxu1 %v548_v19 }
  0xf1   :  { %v586_v24 = vpop.eup %585  ;;  %v313_v25 = vadd.f32 %v312_v23, %v116_v18  ;;  %550 = vmatprep.subr.bf16.mxu1 %v604_v35 }
  0xf2   :  { %595 = vtanh.f32 %v318_v22  ;;  %v551_v26 = vpack.c.bf16 %v584_v21, %v586_v24 }
  0xf3   :  { %597 = vtanh.f32 %v313_v25  ;;  %v505_v28 = vpop.f32.mrb[14].mxu0 }
  0xf4   :  { %v588_v29 = vpop.eup %587  ;;  %v328_v31 = vadd.f32 %v505_v28, %v131_v27  ;;  %v322_v32 = vpop.f32.mrb[15].mxu0  ;;  %552 = vmatpush3.bf16.msra.mxu1 %v551_v26 }
  0xf5   :  { %v590_v33 = vpop.eup %589  ;;  %v323_v34 = vadd.f32 %v322_v32, %v126_v30  ;;  %553 = vmatprep.subr.bf16.mxu1 %v604_v35 }
  0xf6   :  { %599 = vtanh.f32 %v328_v31  ;;  %v554_v36 = vpack.c.bf16 %v588_v29, %v590_v33 }
  0xf7   :  { %601 = vtanh.f32 %v323_v34 }
  0xf8   :  { %v592_v37 = vpop.eup %591  ;;  %555 = vmatpush3.bf16.msra.mxu1 %v554_v36 }
  0xf9   :  { %v594_v38 = vpop.eup %593  ;;  %556 = vmatprep.subr.bf16.mxu1 %v604_v35 }
  0xfa   :  { %v557_v39 = vpack.c.bf16 %v592_v37, %v594_v38 }
  0xfc   :  { %v596_v40 = vpop.eup %595  ;;  %558 = vmatpush3.bf16.msra.mxu1 %v557_v39 }
  0xfd   :  { %v598_v41 = vpop.eup %597  ;;  %559 = vmatprep.subr.bf16.mxu1 %v604_v35 }
  0xfe   :  { %v560_v42 = vpack.c.bf16 %v596_v40, %v598_v41 }
 0x100   :  { %v600_v43 = vpop.eup %599  ;;  %561 = vmatpush3.bf16.msra.mxu1 %v560_v42 }
 0x101   :  { %v602_v44 = vpop.eup %601  ;;  %562 = vmatprep.subr.bf16.mxu1 %v604_v35 }
 0x102   :  { %v563_v45 = vpack.c.bf16 %v600_v43, %v602_v44 }
 0x104   :  { %564 = vmatpush3.bf16.msra.mxu1 %v563_v45 }
 0x107   :  { %539 = vmatmul.mubr.f32.vlgmr.msra.gmra.mrb[0].mxu1 %v347_v46 }
 0x1da   :  { %v420_v48 = vpop.f32.mrb[0].mxu1 }
 0x1db   :  { %v421_v49 = vadd.f32 %v420_v48, %v352_v47  ;;  %v540_v50 = vpop.f32.mrb[1].mxu1 }
 0x1dd   :  { %424 = vst [vmem:[%s774_s5] sm:$0x7] %v421_v49 }

</bundles_post_ra>
